<compile_context>
chip_gen: v7x
topology: tpu7x:2x2x1
jax: 0.10.0
libtpu: 0.0.40
codegen_flags: <defaults>
</compile_context>

<pallas_src>
import functools

import jax
import jax.numpy as jnp
from jax import lax
from jax.experimental import pallas as pl
from jax.experimental.pallas import tpu as pltpu


def _split_bf16(w):
    """Exact-ish f32 -> (hi, lo) bf16 pair with w ~= hi + lo."""
    hi = w.astype(jnp.bfloat16)
    lo = (w - hi.astype(jnp.float32)).astype(jnp.bfloat16)
    return hi, lo


def _finalize(inp, te_pre, neg_ts, lin, bi, rho_sig, out_ref):
    # EUP budget: exactly 3 transcendentals per element (tanh, log, exp).
    te = jnp.tanh(te_pre)
    growth = rho_sig * jnp.log(inp * inp + 0.001)
    resp = inp * (1.0 - growth - te * jnp.exp(neg_ts))
    out_ref[...] = (lin + bi + resp).astype(out_ref.dtype)


def logcellkill_kernel_single(inp_ref, con_ref, wcat_ref, wi_ref, prm_ref,
                              out_ref, *, lanes, precision):
    # Single-dot path: used for mm_mode="highest" (f32 weights, exact) and
    # mm_mode="bf16" (bf16 weights, single MXU pass).
    inp_raw = inp_ref[...]
    con_raw = con_ref[...]
    prm = prm_ref[...]
    bc, bi, rho_sig = prm[0:1, :], prm[1:2, :], prm[2:3, :]

    ct = jnp.dot(con_raw.astype(wcat_ref.dtype), wcat_ref[...],
                 preferred_element_type=jnp.float32, precision=precision)
    lin = jnp.dot(inp_raw.astype(wi_ref.dtype), wi_ref[...],
                  preferred_element_type=jnp.float32, precision=precision)

    inp = inp_raw.astype(jnp.float32)
    te_pre = ct[:, :lanes] + bc           # 128-aligned lane slice: free
    neg_ts = ct[:, lanes:]
    _finalize(inp, te_pre, neg_ts, lin, bi, rho_sig, out_ref)


def logcellkill_kernel_bf16x3(inp_ref, con_ref, wcat_hi_ref, wcat_lo_ref,
                              wi_hi_ref, wi_lo_ref, prm_ref, out_ref, *, lanes):
    # Default f32-I/O path: manual bf16x3 matmuls (3 single-pass MXU dots,
    # f32 accumulation) instead of Precision.HIGHEST's 6-pass emulation.
    inp = inp_ref[...].astype(jnp.float32)
    con = con_ref[...].astype(jnp.float32)
    prm = prm_ref[...]
    bc, bi, rho_sig = prm[0:1, :], prm[1:2, :], prm[2:3, :]

    def split(x):
        hi = x.astype(jnp.bfloat16)
        lo = (x - hi.astype(jnp.float32)).astype(jnp.bfloat16)
        return hi, lo

    def dot1(a, b):
        return jnp.dot(a, b, preferred_element_type=jnp.float32)

    def dot3(x_hi, x_lo, w_hi, w_lo):
        return dot1(x_hi, w_hi) + dot1(x_hi, w_lo) + dot1(x_lo, w_hi)

    con_hi, con_lo = split(con)
    inp_hi, inp_lo = split(inp)
    ct = dot3(con_hi, con_lo, wcat_hi_ref[...], wcat_lo_ref[...])
    lin = dot3(inp_hi, inp_lo, wi_hi_ref[...], wi_lo_ref[...])

    te_pre = ct[:, :lanes] + bc           # 128-aligned lane slice: free
    neg_ts = ct[:, lanes:]
    _finalize(inp, te_pre, neg_ts, lin, bi, rho_sig, out_ref)


def logcellkill_forward(inp, con, params, *, row_tile=2048,
                        io_dtype=jnp.float32, out_dtype=None, mm_mode=None):
    """inp: (B, T, Ds), con: (B, T, Dt).  Returns (B, T, Ds) in out_dtype.

    io_dtype=bf16 halves HBM traffic (inputs are rounded -> extra error vs the
    f32 reference; use only where the model accuracy budget allows).
    mm_mode: None (auto: "bf16" for bf16 I/O, "bf16x3" for f32 I/O),
             "bf16x3", "bf16", or "highest" (exact f32 matmul emulation).
    """
    B, T, Ds = inp.shape
    Dt = con.shape[-1]
    N = B * T

    io_dtype = jnp.dtype(io_dtype)
    out_dtype = io_dtype if out_dtype is None else jnp.dtype(out_dtype)
    bf16 = jnp.dtype(jnp.bfloat16)
    if mm_mode is None:
        mm_mode = "bf16" if io_dtype == bf16 else "bf16x3"
    assert mm_mode in ("bf16x3", "bf16", "highest")

    # ---- lane packing: PACK rows of Ds features -> one 128-lane row --------
    if Ds <= 128 and 128 % Ds == 0:
        PACK = 128 // Ds
    else:
        PACK = 1  # TODO(synk): Ds not dividing 128 keeps narrow-lane stores.
    LANES = PACK * Ds
    CW = PACK * Dt

    inp2 = inp.reshape(N, Ds)
    con2 = con.reshape(N, Dt)
    pad_rows = (-N) % PACK                # at most PACK-1 rows, usually 0
    if pad_rows:
        inp2 = jnp.pad(inp2, ((0, pad_rows), (0, 0)))
        con2 = jnp.pad(con2, ((0, pad_rows), (0, 0)))
    Np = N + pad_rows
    TN = Np // PACK

    # Row-major (Np, Ds) -> (TN, PACK*Ds) keeps the same linear layout (free).
    inp_p = inp2.reshape(TN, LANES).astype(io_dtype)
    con_p = con2.reshape(TN, CW).astype(io_dtype)

    # ---- parameter prep (once, outside the grid loop) -----------------------
    wc = params["wc"].astype(jnp.float32)        # (Dt-1, Ds)
    bc = params["bc"].astype(jnp.float32)        # (1, Ds)
    wi = params["wi"].astype(jnp.float32)        # (Ds, Ds)
    bi = params["bi"].astype(jnp.float32)        # (1, Ds)
    rho = params["rho"].astype(jnp.float32)      # (1, Ds)
    scale = params["scale"].astype(jnp.float32)  # (1, Ds)

    scale_eff = jax.nn.sigmoid(scale) * 2.0
    rho_sig = jax.nn.sigmoid(rho)

    eye = jnp.eye(PACK, dtype=jnp.float32)
    wc_ext = jnp.concatenate([jnp.zeros((1, Ds), jnp.float32), wc], axis=0)
    ts_ext = jnp.concatenate([-scale_eff, jnp.zeros((Dt - 1, Ds), jnp.float32)],
                             axis=0)
    wc_blk = jnp.kron(eye, wc_ext)               # (CW, LANES), tval rows zero
    ts_blk = jnp.kron(eye, ts_ext)               # (CW, LANES), selects -tval*scale
    wi_blk = jnp.kron(eye, wi)                   # (LANES, LANES)
    # One fused con-matmul weight: [:, :LANES] -> controlfxn pre-activation,
    # [:, LANES:] -> -tvals*sigmoid(scale)*2  (single MXU push per tile).
    wcat = jnp.concatenate([wc_blk, ts_blk], axis=1)   # (CW, 2*LANES)

    prm = jnp.concatenate(
        [jnp.tile(bc, (1, PACK)),
         jnp.tile(bi, (1, PACK)),
         jnp.tile(rho_sig, (1, PACK)),
         jnp.zeros((5, LANES), jnp.float32)], axis=0)  # (8, LANES)

    # ---- tiling: no full-array pad/slice; Pallas clips the last block -------
    sub = 16 if (io_dtype == bf16 or out_dtype == bf16) else 8
    MIN_GRID = 4                                  # >= 2 grid steps per v7x TC
    rt = min(row_tile, TN)
    cap = (TN // MIN_GRID) // sub * sub           # largest rt giving >= MIN_GRID steps
    if cap >= sub:
        rt = min(rt, cap)
    rt = max(sub, (rt // sub) * sub)
    grid_n = pl.cdiv(TN, rt)

    rows = lambda i: (i, 0)
    full = lambda i: (0, 0)

    if mm_mode == "bf16x3":
        kernel = functools.partial(logcellkill_kernel_bf16x3, lanes=LANES)
        wcat_hi, wcat_lo = _split_bf16(wcat)
        wi_hi, wi_lo = _split_bf16(wi_blk)
        weight_args = (wcat_hi, wcat_lo, wi_hi, wi_lo)
        weight_specs = [pl.BlockSpec((CW, 2 * LANES), full),
                        pl.BlockSpec((CW, 2 * LANES), full),
                        pl.BlockSpec((LANES, LANES), full),
                        pl.BlockSpec((LANES, LANES), full)]
    else:
        if mm_mode == "highest":
            precision = lax.Precision.HIGHEST
            wdt = jnp.float32
        else:  # "bf16": single-pass MXU dots (pair with io_dtype=bf16)
            precision = None
            wdt = jnp.bfloat16
        kernel = functools.partial(logcellkill_kernel_single, lanes=LANES,
                                   precision=precision)
        weight_args = (wcat.astype(wdt), wi_blk.astype(wdt))
        weight_specs = [pl.BlockSpec((CW, 2 * LANES), full),
                        pl.BlockSpec((LANES, LANES), full)]

    out_p = pl.pallas_call(
        kernel,
        out_shape=jax.ShapeDtypeStruct((TN, LANES), out_dtype),
        grid_spec=pltpu.PrefetchScalarGridSpec(
            num_scalar_prefetch=0,
            grid=(grid_n,),
            in_specs=[
                pl.BlockSpec((rt, LANES), rows),   # inp (lane-packed)
                pl.BlockSpec((rt, CW), rows),      # con (lane-packed, unsplit)
                *weight_specs,                     # constant-index weights
                pl.BlockSpec((8, LANES), full),    # fused bc / bi / sigmoid(rho)
            ],
            out_specs=pl.BlockSpec((rt, LANES), rows),
        ),
        compiler_params=pltpu.CompilerParams(
            dimension_semantics=("parallel",),
            vmem_limit_bytes=32 << 20,
        ),
    )(inp_p, con_p, *weight_args, prm)

    out = out_p.reshape(Np, Ds)
    if pad_rows:
        out = out[:N]
    return out.reshape(B, T, Ds)


def reference_forward(inp, con, params):
    """Pure-JAX reference matching the PyTorch module semantics (f32)."""
    hp = lax.Precision.HIGHEST
    tvals = con[..., :1]
    a = con[..., 1:]
    te = jnp.tanh(jnp.dot(a, params["wc"], precision=hp) + params["bc"][0])
    scale = jax.nn.sigmoid(params["scale"][0]) * 2.0
    growth = jax.nn.sigmoid(params["rho"][0]) * jnp.log(inp ** 2 + 0.001)
    out = inp * (1.0 - growth - te * jnp.exp(-tvals * scale))
    return jnp.dot(inp, params["wi"], precision=hp) + params["bi"][0] + out


def make_params(key, dim_stochastic, dim_treat):
    Ds, Dt = dim_stochastic, dim_treat
    Da = Dt - 1
    k1, k2, k3, k4 = jax.random.split(key, 4)
    # Deterministic synthetic init for the Linear layers (no checkpoint load).
    wc = (jax.random.uniform(k1, (Da, Ds), jnp.float32) - 0.5) * (2.0 / jnp.sqrt(Da))
    bc = (jax.random.uniform(k2, (1, Ds), jnp.float32) - 0.5) * (2.0 / jnp.sqrt(Da))
    wi = (jax.random.uniform(k3, (Ds, Ds), jnp.float32) - 0.5) * (2.0 / jnp.sqrt(Ds))
    bi = (jax.random.uniform(k4, (1, Ds), jnp.float32) - 0.5) * (2.0 / jnp.sqrt(Ds))
    # reset_parameters(): scale = 0.1, rho = 0.5 (constants)
    rho = jnp.full((1, Ds), 0.5, jnp.float32)
    scale = jnp.full((1, Ds), 0.1, jnp.float32)
    return {"wc": wc, "bc": bc, "wi": wi, "bi": bi, "rho": rho, "scale": scale}


if __name__ == "__main__":
    dim_stochastic = 32
    dim_treat = 9           # con feature dim; controlfxn takes dim_treat - 1 = 8
    B, T = 2, 64            # N = 128 rows -> 32 lane-packed rows -> 4 grid steps

    key = jax.random.PRNGKey(0)
    kp, ki, kc = jax.random.split(key, 3)

    params = make_params(kp, dim_stochastic, dim_treat)
    inp = jax.random.normal(ki, (B, T, dim_stochastic), jnp.float32)
    con = jax.random.normal(kc, (B, T, dim_treat), jnp.float32)

    ref = reference_forward(inp, con, params)

    # 1) default fast path: f32 I/O, bf16x3 matmuls (keeps v5e HBM-bound).
    out = jax.block_until_ready(logcellkill_forward(inp, con, params))
    assert out.shape == (B, T, dim_stochastic) and out.dtype == jnp.float32
    nerr = float(jnp.max(jnp.abs(out - ref) / (1.0 + jnp.abs(ref))))
    assert nerr < 5e-3, f"bf16x3 path mismatch vs reference: {nerr}"

    # 2) exact f32 path (full-precision MXU emulation) — strict check.
    out_hi = jax.block_until_ready(
        logcellkill_forward(inp, con, params, mm_mode="highest"))
    err = float(jnp.max(jnp.abs(out_hi - ref)))
    assert err < 1e-4, f"highest path mismatch vs reference: {err}"

    # 3) bf16 HBM I/O smoke test (inputs/outputs rounded -> loose tolerance).
    out_bf = jax.block_until_ready(
        logcellkill_forward(inp, con, params, io_dtype=jnp.bfloat16))
    assert out_bf.dtype == jnp.bfloat16
    nerr_bf = float(jnp.max(
        jnp.abs(out_bf.astype(jnp.float32) - ref) / (1.0 + jnp.abs(ref))))
    assert nerr_bf < 2e-1, f"bf16-io path mismatch vs reference: {nerr_bf}"

    print("KERNEL_OK")
</pallas_src>

<mosaic_0001>
module attributes {stable_mosaic.version = 11 : i64} {
  func.func @logcellkill_kernel_bf16x3(%arg0: i32, %arg1: memref<8x128xf32, #tpu.memory_space<vmem>>, %arg2: memref<8x36xf32, #tpu.memory_space<vmem>>, %arg3: memref<36x256xbf16, #tpu.memory_space<vmem>>, %arg4: memref<36x256xbf16, #tpu.memory_space<vmem>>, %arg5: memref<128x128xbf16, #tpu.memory_space<vmem>>, %arg6: memref<128x128xbf16, #tpu.memory_space<vmem>>, %arg7: memref<8x128xf32, #tpu.memory_space<vmem>>, %arg8: memref<8x128xf32, #tpu.memory_space<vmem>>) attributes {dimension_semantics = [#tpu.dimension_semantics<parallel>], iteration_bounds = array<i64: 4>, scalar_prefetch = 0 : i64, scratch_operands = 0 : i64, tpu.core_type = #tpu.core_type<tc>, window_params = [{transform_indices = @transform_0, window_bounds = array<i64: 8, 128>}, {transform_indices = @transform_1, window_bounds = array<i64: 8, 36>}, {pipeline_mode = #tpu.pipeline_mode<synchronous>, transform_indices = @transform_2, window_bounds = array<i64: 36, 256>}, {pipeline_mode = #tpu.pipeline_mode<synchronous>, transform_indices = @transform_3, window_bounds = array<i64: 36, 256>}, {pipeline_mode = #tpu.pipeline_mode<synchronous>, transform_indices = @transform_4, window_bounds = array<i64: 128, 128>}, {pipeline_mode = #tpu.pipeline_mode<synchronous>, transform_indices = @transform_5, window_bounds = array<i64: 128, 128>}, {pipeline_mode = #tpu.pipeline_mode<synchronous>, transform_indices = @transform_6, window_bounds = array<i64: 8, 128>}, {transform_indices = @transform_7, window_bounds = array<i64: 8, 128>}]} {
    %c0 = arith.constant 0 : index
    %c0_0 = arith.constant 0 : index
    %0 = vector.load %arg1[%c0, %c0_0] : memref<8x128xf32, #tpu.memory_space<vmem>>, vector<8x128xf32>
    %c0_1 = arith.constant 0 : index
    %c0_2 = arith.constant 0 : index
    %1 = vector.load %arg2[%c0_1, %c0_2] : memref<8x36xf32, #tpu.memory_space<vmem>>, vector<8x36xf32>
    %c0_3 = arith.constant 0 : index
    %c0_4 = arith.constant 0 : index
    %2 = vector.load %arg7[%c0_3, %c0_4] : memref<8x128xf32, #tpu.memory_space<vmem>>, vector<8x128xf32>
    %3 = vector.extract_strided_slice %2 {offsets = [0, 0], sizes = [1, 128], strides = [1, 1]} : vector<8x128xf32> to vector<1x128xf32>
    %4 = vector.extract_strided_slice %2 {offsets = [1, 0], sizes = [1, 128], strides = [1, 1]} : vector<8x128xf32> to vector<1x128xf32>
    %5 = vector.extract_strided_slice %2 {offsets = [2, 0], sizes = [1, 128], strides = [1, 1]} : vector<8x128xf32> to vector<1x128xf32>
    %6 = arith.truncf %1 : vector<8x36xf32> to vector<8x36xbf16>
    %7 = arith.extf %6 : vector<8x36xbf16> to vector<8x36xf32>
    %8 = arith.subf %1, %7 : vector<8x36xf32>
    %9 = arith.truncf %8 : vector<8x36xf32> to vector<8x36xbf16>
    %10 = arith.truncf %0 : vector<8x128xf32> to vector<8x128xbf16>
    %11 = arith.extf %10 : vector<8x128xbf16> to vector<8x128xf32>
    %12 = arith.subf %0, %11 : vector<8x128xf32>
    %13 = arith.truncf %12 : vector<8x128xf32> to vector<8x128xbf16>
    %c0_5 = arith.constant 0 : index
    %c0_6 = arith.constant 0 : index
    %14 = vector.load %arg3[%c0_5, %c0_6] : memref<36x256xbf16, #tpu.memory_space<vmem>>, vector<36x256xbf16>
    %c0_7 = arith.constant 0 : index
    %c0_8 = arith.constant 0 : index
    %15 = vector.load %arg4[%c0_7, %c0_8] : memref<36x256xbf16, #tpu.memory_space<vmem>>, vector<36x256xbf16>
    %cst = arith.constant dense<0.000000e+00> : vector<8x256xf32>
    %16 = tpu.matmul %6, %14, %cst {dimension_numbers = #tpu.dot_dimension_numbers<[1], [0], [0], [1], [0, 0, 1, 1], [], []>} : vector<8x36xbf16>, vector<36x256xbf16>, vector<8x256xf32> -> vector<8x256xf32>
    %cst_9 = arith.constant dense<0.000000e+00> : vector<8x256xf32>
    %17 = tpu.matmul %6, %15, %cst_9 {dimension_numbers = #tpu.dot_dimension_numbers<[1], [0], [0], [1], [0, 0, 1, 1], [], []>} : vector<8x36xbf16>, vector<36x256xbf16>, vector<8x256xf32> -> vector<8x256xf32>
    %18 = arith.addf %16, %17 : vector<8x256xf32>
    %cst_10 = arith.constant dense<0.000000e+00> : vector<8x256xf32>
    %19 = tpu.matmul %9, %14, %cst_10 {dimension_numbers = #tpu.dot_dimension_numbers<[1], [0], [0], [1], [0, 0, 1, 1], [], []>} : vector<8x36xbf16>, vector<36x256xbf16>, vector<8x256xf32> -> vector<8x256xf32>
    %20 = arith.addf %18, %19 : vector<8x256xf32>
    %c0_11 = arith.constant 0 : index
    %c0_12 = arith.constant 0 : index
    %21 = vector.load %arg5[%c0_11, %c0_12] : memref<128x128xbf16, #tpu.memory_space<vmem>>, vector<128x128xbf16>
    %c0_13 = arith.constant 0 : index
    %c0_14 = arith.constant 0 : index
    %22 = vector.load %arg6[%c0_13, %c0_14] : memref<128x128xbf16, #tpu.memory_space<vmem>>, vector<128x128xbf16>
    %cst_15 = arith.constant dense<0.000000e+00> : vector<8x128xf32>
    %23 = tpu.matmul %10, %21, %cst_15 {dimension_numbers = #tpu.dot_dimension_numbers<[1], [0], [0], [1], [0, 0, 1, 1], [], []>} : vector<8x128xbf16>, vector<128x128xbf16>, vector<8x128xf32> -> vector<8x128xf32>
    %cst_16 = arith.constant dense<0.000000e+00> : vector<8x128xf32>
    %24 = tpu.matmul %10, %22, %cst_16 {dimension_numbers = #tpu.dot_dimension_numbers<[1], [0], [0], [1], [0, 0, 1, 1], [], []>} : vector<8x128xbf16>, vector<128x128xbf16>, vector<8x128xf32> -> vector<8x128xf32>
    %25 = arith.addf %23, %24 : vector<8x128xf32>
    %cst_17 = arith.constant dense<0.000000e+00> : vector<8x128xf32>
    %26 = tpu.matmul %13, %21, %cst_17 {dimension_numbers = #tpu.dot_dimension_numbers<[1], [0], [0], [1], [0, 0, 1, 1], [], []>} : vector<8x128xbf16>, vector<128x128xbf16>, vector<8x128xf32> -> vector<8x128xf32>
    %27 = arith.addf %25, %26 : vector<8x128xf32>
    %28 = vector.extract_strided_slice %20 {offsets = [0, 0], sizes = [8, 128], strides = [1, 1]} : vector<8x256xf32> to vector<8x128xf32>
    %29 = vector.broadcast %3 : vector<1x128xf32> to vector<8x128xf32>
    %30 = arith.addf %28, %29 : vector<8x128xf32>
    %31 = vector.extract_strided_slice %20 {offsets = [0, 128], sizes = [8, 128], strides = [1, 1]} : vector<8x256xf32> to vector<8x128xf32>
    %32 = math.tanh %30 : vector<8x128xf32>
    %33 = arith.mulf %0, %0 : vector<8x128xf32>
    %cst_18 = arith.constant 1.000000e-03 : f32
    %34 = vector.broadcast %cst_18 : f32 to vector<8x128xf32>
    %35 = arith.addf %33, %34 : vector<8x128xf32>
    %36 = math.log %35 : vector<8x128xf32>
    %37 = vector.broadcast %5 : vector<1x128xf32> to vector<8x128xf32>
    %38 = arith.mulf %37, %36 : vector<8x128xf32>
    %cst_19 = arith.constant 1.000000e+00 : f32
    %39 = vector.broadcast %cst_19 : f32 to vector<8x128xf32>
    %40 = arith.subf %39, %38 : vector<8x128xf32>
    %41 = math.exp %31 : vector<8x128xf32>
    %42 = arith.mulf %32, %41 : vector<8x128xf32>
    %43 = arith.subf %40, %42 : vector<8x128xf32>
    %44 = arith.mulf %0, %43 : vector<8x128xf32>
    %45 = vector.broadcast %4 : vector<1x128xf32> to vector<8x128xf32>
    %46 = arith.addf %27, %45 : vector<8x128xf32>
    %47 = arith.addf %46, %44 : vector<8x128xf32>
    %c0_20 = arith.constant 0 : index
    %c0_21 = arith.constant 0 : index
    %48 = vector.load %arg8[%c0_20, %c0_21] : memref<8x128xf32, #tpu.memory_space<vmem>>, vector<8x128xf32>
    tpu.vector_store %arg8[%c0_20, %c0_21], %47 {strides = array<i32>} : memref<8x128xf32, #tpu.memory_space<vmem>>, vector<8x128xf32>,
    return
  }
  func.func @transform_0(%arg0: i32) -> (i32, i32) {
    %c0_i32 = arith.constant 0 : i32
    %c0_i32_0 = arith.constant 0 : i32
    return %arg0, %c0_i32 : i32, i32
  }
  func.func @transform_1(%arg0: i32) -> (i32, i32) {
    %c0_i32 = arith.constant 0 : i32
    %c0_i32_0 = arith.constant 0 : i32
    return %arg0, %c0_i32 : i32, i32
  }
  func.func @transform_2(%arg0: i32) -> (i32, i32) {
    %c0_i32 = arith.constant 0 : i32
    %c0_i32_0 = arith.constant 0 : i32
    %c0_i32_1 = arith.constant 0 : i32
    return %c0_i32, %c0_i32_0 : i32, i32
  }
  func.func @transform_3(%arg0: i32) -> (i32, i32) {
    %c0_i32 = arith.constant 0 : i32
    %c0_i32_0 = arith.constant 0 : i32
    %c0_i32_1 = arith.constant 0 : i32
    return %c0_i32, %c0_i32_0 : i32, i32
  }
  func.func @transform_4(%arg0: i32) -> (i32, i32) {
    %c0_i32 = arith.constant 0 : i32
    %c0_i32_0 = arith.constant 0 : i32
    %c0_i32_1 = arith.constant 0 : i32
    return %c0_i32, %c0_i32_0 : i32, i32
  }
  func.func @transform_5(%arg0: i32) -> (i32, i32) {
    %c0_i32 = arith.constant 0 : i32
    %c0_i32_0 = arith.constant 0 : i32
    %c0_i32_1 = arith.constant 0 : i32
    return %c0_i32, %c0_i32_0 : i32, i32
  }
  func.func @transform_6(%arg0: i32) -> (i32, i32) {
    %c0_i32 = arith.constant 0 : i32
    %c0_i32_0 = arith.constant 0 : i32
    %c0_i32_1 = arith.constant 0 : i32
    return %c0_i32, %c0_i32_0 : i32, i32
  }
  func.func @transform_7(%arg0: i32) -> (i32, i32) {
    %c0_i32 = arith.constant 0 : i32
    %c0_i32_0 = arith.constant 0 : i32
    return %arg0, %c0_i32 : i32, i32
  }
}

</mosaic_0001>

<bundles_post_ra>
// kernel: tpu_custom_call.1
= control target key start
LH: loop header
LB: loop body
LE: loop exit
PB: predicated region body
PF: predicated region fallthrough
CT: control target
= control target key end

     0   :  { %s1993_s0 = inlined_call_operand.hbm [shape: f32[32,128], index: 0, kind: input, shape index: {}]   ;;  %s1994_s1 = inlined_call_operand.hbm [shape: f32[32,36], index: 1, kind: input, shape index: {}]   ;;  %s1995_s2 = inlined_call_operand.hbm [shape: bf16[36,256], index: 2, kind: input, shape index: {}]   ;;  %s1996_s3 = inlined_call_operand.hbm [shape: bf16[36,256], index: 3, kind: input, shape index: {}]   ;;  %s1997_s4 = inlined_call_operand.hbm [shape: bf16[128,128], index: 4, kind: input, shape index: {}]   ;;  %s1998_s5 = inlined_call_operand.hbm [shape: bf16[128,128], index: 5, kind: input, shape index: {}]   ;;  %s1999_s6 = inlined_call_operand.vmem [shape: f32[8,128], index: 6, kind: input, shape index: {}]   ;;  %s2000_s7 = inlined_call_operand.hbm [shape: f32[32,128], index: 7, kind: output, shape index: {}]  }
   0x1   :  { %2005 = sst [smem:[#allocation20_spill]] %s1995_s2 }
   0x2   :  { %2006 = sst [smem:[#allocation21_spill]] %s1996_s3 }
   0x3   :  { %2007 = sst [smem:[#allocation22_spill]] %s1997_s4 }
   0x4   :  { %2008 = sst [smem:[#allocation23_spill]] %s1998_s5 }
   0x5   :  { %12 = vsyncpa [#allocation3], 0 }
   0x6   :  { %14 = vsyncpa [#allocation3 + $0x1], 0 }
   0x7   :  { %15 = vsyncpa [#allocation6], 0 }
   0x8   :  { %17 = vsyncpa [#allocation6 + $0x1], 0 }
   0x9   :  { %18 = vsyncpa [#allocation9], 0 }
   0xa   :  { %19 = vsyncpa [#allocation12], 0 }
   0xb   :  { %20 = vsyncpa [#allocation4], 0 }
   0xc   :  { %22 = vsyncpa [#allocation4 + $0x1], 0  ;;  %s1619_s24 = smov 0   ;;  %s1621_s25 = smov 0  }
   0xd   :  { %s1623_s26 = smov 0   ;;  %s1625_s27 = smov 0  }
   0xe LB: > { %s1565_s28 = smov [#allocation7]   ;;  %s1640_s30 = sadd.s32 4294967295, %s1563_s27   ;;  %s1563_s27 = sphi %s1625_s27, %s2035_s27   ;;  %s1559_s26 = sphi %s1623_s26, %s2034_s26   ;;  %s1555_s25 = sphi %s1621_s25, %s2033_s25   ;;  %s1551_s24 = sphi %s1619_s24, %s2032_s24  }
   0xf   : > { %s228_s29 = sshll.u32 %s1565_s28, 4  ;;  %p1029_p0 = scmp.ge.s32.totalorder %s1563_s27, 1  ;;  %s1645_s29 = int_to_ptr.vmem [resolvable:$true] %s228_s29 }
  0x10   : > { %p2001_p1 = scmp.eq.s32.totalorder %s1640_s30, 0  ;;  %p216_p2 = scmp.lt.s32.totalorder %s1563_s27, 5 }
  0x11   : > { %s1566_s9 = smov [#allocation8]   ;;  %s1567_s12 = smov [#allocation10]  }
  0x12   : > { %p1647_p3 = pnand %p1029_p0, %p216_p2  ;;  %s241_s10 = sshll.u32 %s1566_s9, 4  ;;  %s1659_s10 = int_to_ptr.vmem [resolvable:$true] %s241_s10 }
  0x13   : > { %s254_s13 = sshll.u32 %s1567_s12, 4  ;;  %s2011_s2 = sld [smem:[#allocation20_spill]]  ;;  %s1661_s13 = int_to_ptr.vmem [resolvable:$true] %s254_s13 }
  0x14   : > { %s2009_s8 = scalar_select %p1647_p3, 1, 0 }
  0x15   : > { %p1194_p4 = pneg %p1647_p3 }
  0x17   : > { %p1655_p5 = pnand %p1194_p4, %p2001_p1 }
  0x19   : > { %s1309_s16 = scalar_lea.hbm %s2011_s2, 640  ;;  %p1671_p7 = pneg %p1655_p5 }
  0x1a   : > { %p1310_p6 = scmp.ne.s32.totalorder %s2011_s2, %s1309_s16  ;;  %p1316_p10 = scmp.lt.u32.totalorder %s1309_s16, %s2011_s2 }
  0x1c   : > { %p1312_p8 = pnand %p1671_p7, %p1310_p6 }
  0x1e   : > { %p1313_p9 = pneg %p1312_p8 }
  0x20   : > { %p1318_p11 = pnand %p1316_p10, %p1313_p9 }
  0x22   : > { %1321 = shalt.err (!%p1318_p11)
}
  0x23   : > { %s1322_s22 = scalar_lea.vmem %s1645_s29, 640  ;;  %p1330_p2 = scmp.lt.s32.totalorder %s1645_s29, %s1645_s29 }
  0x24   : > { %p1323_p12 = scmp.ne.s32.totalorder %s1645_s29, %s1322_s22  ;;  %p1331_p4 = scmp.lt.s32.totalorder %s1322_s22, %s1322_s22 }
  0x26   : > { %p1325_p13 = pnand %p1323_p12, %p1671_p7  ;;  %p1332_p6 = por %p1331_p4, %p1330_p2 }
  0x28   : > { %p1326_p0 = pneg %p1325_p13 }
  0x2a   : > { %p1333_p8 = pnand %p1332_p6, %p1326_p0 }
  0x2c   : > { %1336 = shalt.err (!%p1333_p8)
}
  0x2d   : > { %s1568_s23 = smov 128   ;;  %s1569_s28 = smov 8  }
  0x2e   : > { %1197 = dma.hbm_to_vmem [thread:$0]  (!%p1655_p5), %s2011_s2, 640, %s1645_s29, [#allocation6], %s1568_s23, %s1568_s23, %s1569_s28  }
  0x2f   : > { %s2013_s3 = sld [smem:[#allocation21_spill]] }
  0x35   : > { %s1337_s16 = scalar_lea.hbm %s2013_s3, 640 }
  0x36   : > { %p1338_p9 = scmp.ne.s32.totalorder %s2013_s3, %s1337_s16  ;;  %p1344_p12 = scmp.lt.u32.totalorder %s1337_s16, %s2013_s3 }
  0x38   : > { %p1340_p10 = pnand %p1338_p9, %p1671_p7 }
  0x3a   : > { %p1341_p11 = pneg %p1340_p10 }
  0x3c   : > { %p1346_p13 = pnand %p1344_p12, %p1341_p11 }
  0x3e   : > { %1349 = shalt.err (!%p1346_p13)
}
  0x3f   : > { %s1350_s29 = scalar_lea.vmem %s1659_s10, 640  ;;  %p1358_p6 = scmp.lt.s32.totalorder %s1659_s10, %s1659_s10 }
  0x40   : > { %p1351_p0 = scmp.ne.s32.totalorder %s1659_s10, %s1350_s29  ;;  %p1359_p8 = scmp.lt.s32.totalorder %s1350_s29, %s1350_s29 }
  0x42   : > { %p1353_p2 = pnand %p1351_p0, %p1671_p7  ;;  %p1360_p9 = por %p1359_p8, %p1358_p6 }
  0x44   : > { %p1354_p4 = pneg %p1353_p2 }
  0x46   : > { %p1361_p10 = pnand %p1360_p9, %p1354_p4 }
  0x48   : > { %1364 = shalt.err (!%p1361_p10)
}
  0x49   : > { %1200 = dma.hbm_to_vmem [thread:$0]  (!%p1655_p5), %s2013_s3, 640, %s1659_s10, [#allocation9], %s1568_s23, %s1568_s23, %s1569_s28  }
  0x4a   : > { %s2014_s4 = sld [smem:[#allocation22_spill]] }
  0x50   : > { %s1365_s15 = scalar_lea.hbm %s2014_s4, 1024 }
  0x51   : > { %p1366_p11 = scmp.ne.s32.totalorder %s2014_s4, %s1365_s15  ;;  %p1372_p0 = scmp.lt.u32.totalorder %s1365_s15, %s2014_s4 }
  0x53   : > { %p1368_p12 = pnand %p1366_p11, %p1671_p7 }
  0x55   : > { %p1369_p13 = pneg %p1368_p12 }
  0x57   : > { %p1374_p2 = pnand %p1372_p0, %p1369_p13 }
  0x59   : > { %1377 = shalt.err (!%p1374_p2)
}
  0x5a   : > { %s1378_s10 = scalar_lea.vmem %s1661_s13, 1024  ;;  %p1386_p9 = scmp.lt.s32.totalorder %s1661_s13, %s1661_s13 }
  0x5b   : > { %p1379_p4 = scmp.ne.s32.totalorder %s1661_s13, %s1378_s10  ;;  %p1387_p10 = scmp.lt.s32.totalorder %s1378_s10, %s1378_s10 }
  0x5d   : > { %p1381_p6 = pnand %p1379_p4, %p1671_p7  ;;  %p1388_p11 = por %p1387_p10, %p1386_p9 }
  0x5f   : > { %p1382_p8 = pneg %p1381_p6 }
  0x61   : > { %p1389_p12 = pnand %p1388_p11, %p1382_p8 }
  0x63   : > { %1392 = shalt.err (!%p1389_p12)
}
  0x64   : > { %s1570_s23 = smov 64   ;;  %s1571_s28 = smov 4  }
  0x65   : > { %1203 = dma.hbm_to_vmem [thread:$0]  (!%p1655_p5), %s2014_s4, 1024, %s1661_s13, [#allocation9], %s1570_s23, %s1570_s23, %s1571_s28  }
  0x66   : > { %s1572_s22 = smov [#allocation11]   ;;  %s2015_s5 = sld [smem:[#allocation23_spill]] }
  0x67   : > { %s267_s9 = sshll.u32 %s1572_s22, 4  ;;  %s268_s9 = int_to_ptr.vmem [resolvable:$true] %s267_s9 }
  0x6c   : > { %s1393_s15 = scalar_lea.hbm %s2015_s5, 1024 }
  0x6d   : > { %p1394_p13 = scmp.ne.s32.totalorder %s2015_s5, %s1393_s15  ;;  %p1400_p4 = scmp.lt.u32.totalorder %s1393_s15, %s2015_s5 }
  0x6f   : > { %p1396_p0 = pnand %p1394_p13, %p1671_p7 }
  0x71   : > { %p1397_p2 = pneg %p1396_p0 }
  0x73   : > { %p1402_p6 = pnand %p1400_p4, %p1397_p2 }
  0x75   : > { %1405 = shalt.err (!%p1402_p6)
}
  0x76   : > { %s1406_s13 = scalar_lea.vmem %s268_s9, 1024  ;;  %p1414_p11 = scmp.lt.s32.totalorder %s268_s9, %s268_s9 }
  0x77   : > { %p1407_p8 = scmp.ne.s32.totalorder %s268_s9, %s1406_s13  ;;  %p1415_p12 = scmp.lt.s32.totalorder %s1406_s13, %s1406_s13 }
  0x79   : > { %p1409_p9 = pnand %p1407_p8, %p1671_p7  ;;  %p1416_p1 = por %p1415_p12, %p1414_p11 }
  0x7b   : > { %p1410_p10 = pneg %p1409_p9 }
  0x7d   : > { %p1417_p3 = pnand %p1416_p1, %p1410_p10 }
  0x7f   : > { %1420 = shalt.err (!%p1417_p3)
}
  0x80   : > { %1206 = dma.hbm_to_vmem [thread:$0]  (!%p1655_p5), %s2015_s5, 1024, %s268_s9, [#allocation12], %s1570_s23, %s1570_s23, %s1571_s28  }
  0x81   : > { %s1028_s19 = sadd.s32 4294967294, %s1563_s27   ;;  %s1758_s11 = sadd.s32 1, %s1563_s27  }
  0x82   : > { %s32_s29 = ssub.s32 %s1563_s27, %s1758_s11  ;;  %s35_s22 = sadd.s32 1, %s1559_s26 }
  0x83   : > { %p33_p1 = scmp.eq.s32.totalorder %s32_s29, 0  ;;  %p42_p3 = scmp.ne.s32.totalorder %s1559_s26, %s1555_s25 }
  0x84   : > { %p43_p7 = scmp.eq.s32.totalorder %s1563_s27, 0  ;;  %p48_p13 = scmp.ne.s32.totalorder %s1555_s25, %s1551_s24 }
  0x85   : > { %s1769_s12 = scalar_select %p33_p1, %s1559_s26, %s35_s22  }
  0x86   : > { %p1771_p0 = por %p43_p7, %p42_p3  ;;  %p2017_p2 = scmp.eq.s32.totalorder %s1640_s30, 0 }
  0x87   : > { %p203_p4 = scmp.eq.s32.totalorder %s1640_s30, 3  ;;  %p209_p6 = scmp.eq.s32.totalorder %s1028_s19, 3 }
  0x88   : > { %p1777_p5 = por %p2017_p2, %p48_p13  ;;  %p1222_p8 = scmp.lt.s32.totalorder %s1563_s27, 4 }
  0x89   : > { %s284_s28 = sand.u32 1, %s1559_s26   ;;  %p1784_p9 = por %p203_p4, %p42_p3 }
  0x8a   : > { %s2018_s23 = scalar_select %p1777_p5, 1, 0 }
  0x8b   : > { %s2019_s9 = scalar_select %p1784_p9, 1, 0 }
  0x8c   : > { %p1788_p10 = por %p209_p6, %p48_p13  ;;  %s1792_s16 = sshll.u32 %s284_s28, 3 }
  0x8d   : > { %s1036_s17 = sshll.u32 %s1563_s27, 7  ;;  %s288_s10 = scalar_lea.vmem [#allocation2], %s1792_s16 }
  0x8e   : > { %s2020_s15 = scalar_select %p1788_p10, 1, 0 }
  0x8f   : > { %s1798_s13 = scalar_lea.hbm %s1993_s0, %s1036_s17  ;;  %s295_s21 = sshll.u32 %s288_s10, 4  ;;  %s1801_s21 = int_to_ptr.vmem [resolvable:$true] %s295_s21 }
  0x90   : > { %p1805_p11 = pnand %p1222_p8, %p1771_p0  ;;  %s1812_s18 = scalar_lea.hbm %s1994_s1, %s1036_s17 }
  0x91   : > { %s302_s20 = sand.u32 1, %s1563_s27   ;;  %s285_s2 = scalar_lea.sflag [#allocation3], %s284_s28 }
  0x92   : > { %s1421_s3 = scalar_lea.hbm %s1798_s13, 128  ;;  %p1423_p1 = pneg %p1805_p11 }
  0x93   : > { %p1422_p12 = scmp.ne.s32.totalorder %s1798_s13, %s1421_s3  ;;  %s1426_s4 = scalar_lea.hbm %s1993_s0, 512 }
  0x94   : > { %p1427_p13 = scmp.lt.u32.totalorder %s1798_s13, %s1993_s0  ;;  %p1428_p0 = scmp.lt.u32.totalorder %s1426_s4, %s1421_s3 }
  0x95   : > { %p1424_p3 = pnand %p1423_p1, %p1422_p12  ;;  %p1430_p4 = scmp.lt.u32.totalorder %s1421_s3, %s1798_s13 }
  0x96   : > { %p1429_p2 = por %p1428_p0, %p1427_p13 }
  0x97   : > { %p1425_p7 = pneg %p1424_p3 }
  0x98   : > { %p1431_p6 = por %p1430_p4, %p1429_p2 }
  0x9a   : > { %p1432_p8 = pnand %p1431_p6, %p1425_p7 }
  0x9c   : > { %1435 = shalt.err (!%p1432_p8)
}
  0x9d   : > { %s1436_s28 = scalar_lea.vmem %s1801_s21, 128  ;;  %s1573_s17 = smov [#allocation2]  }
  0x9e   : > { %p1437_p12 = scmp.ne.s32.totalorder %s1801_s21, %s1436_s28  ;;  %s1441_s22 = sshll.u32 %s1573_s17, 4  ;;  %s1442_s22 = int_to_ptr.vmem [resolvable:$false] %s1441_s22 }
  0x9f   : > { %s1443_s5 = scalar_lea.vmem %s1442_s22, 256  ;;  %p1444_p9 = scmp.lt.s32.totalorder %s1801_s21, %s1442_s22 }
  0xa0   : > { %p1439_p3 = pnand %p1437_p12, %p1423_p1  ;;  %p1445_p13 = scmp.lt.s32.totalorder %s1443_s5, %s1436_s28 }
  0xa2   : > { %p1440_p10 = pneg %p1439_p3  ;;  %p1446_p0 = por %p1445_p13, %p1444_p9 }
  0xa4   : > { %p1447_p2 = pnand %p1446_p0, %p1440_p10 }
  0xa6   : > { %1450 = shalt.err (!%p1447_p2)
}
  0xa7   : > { %1210 = dma.hbm_to_vmem [thread:$0]  (!%p1805_p11), %s1798_s13, 128, %s1801_s21, %s285_s2  }
  0xa8   : > { %s306_s3 = scalar_lea.vmem [#allocation5], %s1792_s16  ;;  %s303_s14 = scalar_lea.sflag [#allocation6], %s302_s20 }
  0xa9   : > { %s313_s4 = sshll.u32 %s306_s3, 4  ;;  %s1451_s10 = scalar_lea.hbm %s1812_s18, 128  ;;  %s314_s4 = int_to_ptr.vmem [resolvable:$true] %s313_s4 }
  0xaa   : > { %p1452_p9 = scmp.ne.s32.totalorder %s1812_s18, %s1451_s10  ;;  %s1456_s17 = scalar_lea.hbm %s1994_s1, 512 }
  0xab   : > { %p1457_p4 = scmp.lt.u32.totalorder %s1812_s18, %s1994_s1  ;;  %p1458_p6 = scmp.lt.u32.totalorder %s1456_s17, %s1451_s10 }
  0xac   : > { %p1454_p10 = pnand %p1452_p9, %p1423_p1  ;;  %p1460_p12 = scmp.lt.u32.totalorder %s1451_s10, %s1812_s18 }
  0xad   : > { %p1459_p8 = por %p1458_p6, %p1457_p4 }
  0xae   : > { %p1455_p7 = pneg %p1454_p10 }
  0xaf   : > { %p1461_p3 = por %p1460_p12, %p1459_p8 }
  0xb1   : > { %p1462_p13 = pnand %p1461_p3, %p1455_p7 }
  0xb3   : > { %1465 = shalt.err (!%p1462_p13)
}
  0xb4   : > { %s1466_s2 = scalar_lea.vmem %s314_s4, 128  ;;  %s1574_s16 = smov [#allocation5]  }
  0xb5   : > { %p1467_p0 = scmp.ne.s32.totalorder %s314_s4, %s1466_s2  ;;  %s1471_s13 = sshll.u32 %s1574_s16, 4  ;;  %s1472_s13 = int_to_ptr.vmem [resolvable:$false] %s1471_s13 }
  0xb6   : > { %s1473_s21 = scalar_lea.vmem %s1472_s13, 256  ;;  %p1474_p10 = scmp.lt.s32.totalorder %s314_s4, %s1472_s13 }
  0xb7   : > { %p1469_p2 = pnand %p1467_p0, %p1423_p1  ;;  %p1475_p5 = scmp.lt.s32.totalorder %s1473_s21, %s1466_s2 }
  0xb9   : > { %p1470_p9 = pneg %p1469_p2  ;;  %p1476_p4 = por %p1475_p5, %p1474_p10 }
  0xbb   : > { %p1477_p6 = pnand %p1476_p4, %p1470_p9 }
  0xbd   : > { %1480 = shalt.err (!%p1477_p6)
}
  0xbe   : > { %1213 = dma.hbm_to_vmem [thread:$0]  (!%p1805_p11), %s1812_s18, 128, %s314_s4, %s303_s14  }
  0xbf   : > { %p2022_p7 = scmp.ne.s32.totalorder %s2009_s8, 0 }
  0xc0   : > { %s1865_s20 = sand.u32 (!%p2022_p7), 1, %s1555_s25   ;;  %p2023_p5 = scmp.ne.s32.totalorder (!%p2022_p7), %s2018_s23, 0 }
  0xc1   : > { %322 = sbr.rel (%p2022_p7) target bundleno = 518 (0x206), region = 48  ;;  %s1868_s3 = sshll.u32 (!%p2022_p7), %s1865_s20, 3 }
  0xc2   : > { %s325_s10 = scalar_lea.sflag (!%p2022_p7), [#allocation3], %s1865_s20  ;;  %s328_s29 = scalar_lea.vmem (!%p2022_p7), [#allocation2], %s1868_s3 }
  0xc8   : > { %1526 = dma.done.wait (%p2023_p5), %s325_s10, 128  }
  0xc9   : > { %1528 = vsyncadd (%p2023_p5), %s325_s10, 4294967168  ;;  %s333_s8 = sand.u32 1, %s1640_s30   ;;  %s337_s18 = scalar_lea.vmem [#allocation5], %s1868_s3 }
  0xca   : > { %s334_s19 = scalar_lea.sflag [#allocation6], %s333_s8 }
  0xcb   : > { %1530 = dma.done.wait (%p2023_p5), %s334_s19, 128  }
  0xcc   : > { %1532 = vsyncadd (%p2023_p5), %s334_s19, 4294967168  ;;  %p2024_p11 = scmp.eq.s32.totalorder %s1640_s30, 0 }
  0xce   : > { %1534 = dma.done.wait (%p2024_p11), [#allocation6], 640   ;;  %p2025_p1 = pmov %p2024_p11 }
  0xd0   : > { %1536 = vsyncadd (%p2025_p1), [#allocation6], 4294966656  ;;  %p2026_p8 = pmov %p2025_p1 }
  0xd1   : > { %p2027_p12 = pmov %p2025_p1 }
  0xd2   : > { %1538 = dma.done.wait (%p2026_p8), [#allocation9], 1664  }
  0xd3   : > { %1540 = vsyncadd (%p2027_p12), [#allocation9], 4294965632  ;;  %p2028_p3 = pmov %p2025_p1 }
  0xd4   : > { %p2029_p13 = pmov %p2025_p1 }
  0xd5   : > { %1542 = dma.done.wait (%p2028_p3), [#allocation12], 1024  }
  0xd6   : > { %1544 = vsyncadd (%p2029_p13), [#allocation12], 4294966272  ;;  %v1575_v0 = vmov 0.0   ;;  %v1576_v1 = vmov 0   ;;  %vm1577_vm0 = vmmov 0   ;;  %v1276_v5 = vld [vmem:[#allocation11] sm:$0xff]   ;;  %v855_v48 = vlaneseq }
  0xd7   : > { %1112 = vmatprep.subr.bf16.mxu1 %v1575_v0  ;;  %479 = vmatprep.mubr.bf16.mxu0 %v1576_v1  ;;  %v1271_v2 = vld [vmem:[#allocation8 + $0x4] ss:$8 sps:$4 sm:$0xff]   ;;  %v1273_v3 = vld [vmem:[#allocation8] ss:$8 sps:$4 sm:$0xff]   ;;  %v1274_v4 = vld [vmem:[#allocation8 + $0x14] ss:$8 sps:$4 sm:$0xff]  }
  0xd8   : > { %1128 = vmatprep.mubr.msk.bf16.mxu1 %vm1577_vm0, %v1575_v0  ;;  %447 = vmatprep.subr.bf16.mxu0 %v1271_v2  ;;  %v1277_v6 = vld [vmem:[#allocation8 + $0x10] ss:$8 sps:$4 sm:$0xff]   ;;  %v410_v7 = vld [vmem:[#allocation8 + $0x20] sm:$0x33]  ;;  %vm440_vm1 = vcmask 1041408   ;;  %vm436_vm2 = vcmask 293888  }
  0xd9   : > { %448 = vmatpush1.bf16.msra.mxu0 %v1273_v3  ;;  %v1052_v8 = vcombine.high %v410_v7, %v410_v7  ;;  %v1051_v9 = vcombine.low %v410_v7, %v410_v7  ;;  %1113 = vmatpush3.bf16.msra.mxu1 %v1276_v5  ;;  %v1279_v10 = vld [vmem:[#allocation11 + $0x8] sm:$0xff]   ;;  %v1283_v13 = vld [vmem:[#allocation7 + $0x4] ss:$8 sps:$4 sm:$0xff]   ;;  %v1281_v16 = vld [vmem:[#allocation7] ss:$8 sps:$4 sm:$0xff]   ;;  %v856_v55 = vshrl.u32 %v855_v48, 7 }
  0xda   : > { %449 = vmatprep.subr.bf16.mxu0 %v1274_v4  ;;  %1114 = vmatprep.subr.bf16.mxu1 %v1575_v0  ;;  %v391_v11 = vld [vmem:[%s337_s18] sm:$0xff]  ;;  %v1284_v14 = vld [vmem:[#allocation11 + $0x10] sm:$0xff]   ;;  %v1288_v18 = vld [vmem:[#allocation11 + $0x18] sm:$0xff]   ;;  %s1082_s14 = sshll.u32 %s1640_s30, 7  ;;  %s388_s28 = scalar_lea.vmem [#allocation13], %s1868_s3 }
  0xdb   : > { %v442_v12 = vsel %vm440_vm1, %v1051_v9, 0  ;;  %v393_v15 = vpack.c.bf16 %v391_v11, %v391_v11  ;;  %v1287_v17 = vld [vmem:[#allocation7 + $0x14] ss:$8 sps:$4 sm:$0xff]   ;;  %v405_v19 = vld [vmem:[#allocation7 + $0x20] sm:$0x33]  ;;  %v1294_v28 = vld [vmem:[#allocation11 + $0x38] sm:$0xff]   ;;  %s1950_s2 = scalar_lea.hbm %s2000_s7, %s1082_s14 }
  0xdc   : > { %v1285_v20 = vld [vmem:[#allocation7 + $0x10] ss:$8 sps:$4 sm:$0xff]   ;;  %v1060_v21 = vcombine.high %v405_v19, %v405_v19  ;;  %v1059_v22 = vcombine.low %v405_v19, %v405_v19  ;;  %v1293_v26 = vld [vmem:[#allocation11 + $0x30] sm:$0xff]   ;;  %v1298_v36 = vld [vmem:[#allocation10 + $0x18] sm:$0xff]   ;;  %v857_v56 = vsub.s32 0, %v856_v55  ;;  %s897_s17 = sshll.u32 %s388_s28, 4  ;;  %s1952_s17 = int_to_ptr.vmem [resolvable:$true] %s897_s17 }
  0xdd   : > { %450 = vmatpush1.bf16.msra.mxu0 %v1277_v6  ;;  %1115 = vmatpush3.bf16.msra.mxu1 %v1279_v10  ;;  %v1290_v23 = vld [vmem:[#allocation11 + $0x20] sm:$0xff]   ;;  %v1292_v25 = vld [vmem:[#allocation11 + $0x28] sm:$0xff]   ;;  %v394_v27 = vunpack.c.l.bf16 %v393_v15  ;;  %v1911_v29 = vld [vmem:[%s328_s29] sm:$0xff]  ;;  %s884_s16 = scalar_lea.sflag [#allocation4], %s1865_s20  ;;  %s1481_s13 = scalar_lea.vmem %s1952_s17, 128 }
  0xde   : > { %1053 = vmatprep.subr.msk.bf16.mxu0 %vm440_vm1, %v1052_v8  ;;  %1116 = vmatprep.subr.bf16.mxu1 %v1575_v0  ;;  %v514_v24 = vsel %vm440_vm1, %v1059_v22, 0  ;;  %v397_v31 = vpack.c.bf16 %v1911_v29, %v1911_v29  ;;  %v1295_v32 = vld [vmem:[#allocation10] sm:$0xff]   ;;  %v1296_v34 = vld [vmem:[#allocation10 + $0x8] sm:$0xff]   ;;  %v1297_v35 = vld [vmem:[#allocation10 + $0x10] sm:$0xff]   ;;  %v861_v61 = vmul.f32 %v1911_v29, %v1911_v29  ;;  %p1482_p0 = scmp.ne.s32.totalorder %s1952_s17, %s1481_s13  ;;  %p2030_p2 = scmp.ne.s32.totalorder %s2019_s9, 0 }
  0xdf   : > { %v395_v30 = vsub.f32 %v391_v11, %v394_v27  ;;  %v1299_v37 = vld [vmem:[#allocation10 + $0x20] sm:$0xff]   ;;  %v1300_v38 = vld [vmem:[#allocation10 + $0x28] sm:$0xff]   ;;  %v1301_v40 = vld [vmem:[#allocation10 + $0x30] sm:$0xff]   ;;  %v867_v11 = vsub.s32 2, %v856_v55  ;;  %s1578_s30 = smov [#allocation13]  }
  0xe0   : > { %v398_v39 = vunpack.c.l.bf16 %v397_v31  ;;  %v1302_v42 = vld [vmem:[#allocation10 + $0x38] sm:$0xff]   ;;  %v392_v57 = vld [vmem:[%s1999_s6] sm:$0xff]  ;;  %v862_v7 = vadd.f32 0.001, %v861_v61  ;;  %p1483_p9 = pnand %p1482_p0, %p2030_p2  ;;  %s1485_s21 = sshll.u32 %s1578_s30, 4  ;;  %s1486_s21 = int_to_ptr.vmem [resolvable:$false] %s1485_s21 }
  0xe1   : > { %452 = vmatpush1.bf16.msra.mxu0 %v442_v12  ;;  %1117 = vmatpush3.bf16.msra.mxu1 %v1284_v14  ;;  %v396_v33 = vpack.c.bf16 %v395_v30, %v395_v30  ;;  %v858_v59 = vrot.slane %v392_v57, %v857_v56  ;;  %s1487_s3 = scalar_lea.vmem %s1486_s21, 256  ;;  %p1488_p4 = scmp.lt.s32.totalorder %s1952_s17, %s1486_s21 }
  0xe2   : > { %519 = vmatprep.subr.bf16.mxu0 %v1283_v13  ;;  %1118 = vmatprep.subr.bf16.mxu1 %v1575_v0  ;;  %v399_v41 = vsub.f32 %v1911_v29, %v398_v39  ;;  %p1484_p10 = pneg %p1483_p9  ;;  %p1489_p6 = scmp.lt.s32.totalorder %s1487_s3, %s1481_s13 }
  0xe4   : > { %1054 = vmatmul.mubr.msk.bf16.vlgmr.msra.gmra.mrb[0].mxu0 %vm436_vm2, %v393_v15  ;;  %v400_v43 = vpack.c.bf16 %v399_v41, %v399_v41  ;;  %p1490_p7 = por %p1489_p6, %p1488_p4 }
  0xe5   : > { %520 = vmatpush1.bf16.msra.mxu0 %v1281_v16  ;;  %551 = vmatprep.mubr.bf16.mxu0 %v1576_v1 }
  0xe6   : > { %521 = vmatprep.subr.bf16.mxu0 %v1287_v17  ;;  %1119 = vmatpush3.bf16.msra.mxu1 %v1288_v18  ;;  %v878_v18 = vsub.s32 1, %v856_v55  ;;  %p1491_p5 = pnand %p1490_p7, %p1484_p10 }
  0xe7   : > { %1120 = vmatprep.subr.bf16.mxu1 %v1575_v0 }
  0xe9   : > { %522 = vmatpush1.bf16.msra.mxu0 %v1285_v20 }
  0xea   : > { %1061 = vmatprep.subr.msk.bf16.mxu0 %vm440_vm1, %v1060_v21  ;;  %1121 = vmatpush3.bf16.msra.mxu1 %v1290_v23 }
  0xeb   : > { %1122 = vmatprep.subr.bf16.mxu1 %v1575_v0 }
  0xed   : > { %524 = vmatpush1.bf16.msra.mxu0 %v514_v24 }
  0xee   : > { %563 = vmatprep.subr.bf16.mxu0 %v1283_v13  ;;  %1123 = vmatpush3.bf16.msra.mxu1 %v1292_v25  ;;  %v879_v25 = vrot.slane %v392_v57, %v878_v18 }
  0xef   : > { %1124 = vmatprep.subr.bf16.mxu1 %v1575_v0 }
  0xf0   : > { %1062 = vmatmul.mubr.msk.bf16.vlgmr.msra.gmra.mrb[4].mxu0 %vm436_vm2, %v393_v15  ;;  %v868_v15 = vrot.slane %v392_v57, %v867_v11 }
  0xf1   : > { %564 = vmatpush1.bf16.msra.mxu0 %v1281_v16  ;;  %595 = vmatprep.mubr.bf16.mxu0 %v1576_v1 }
  0xf2   : > { %565 = vmatprep.subr.bf16.mxu0 %v1287_v17  ;;  %1125 = vmatpush3.bf16.msra.mxu1 %v1293_v26 }
  0xf3   : > { %1126 = vmatprep.subr.bf16.mxu1 %v1575_v0 }
  0xf5   : > { %566 = vmatpush1.bf16.msra.mxu0 %v1285_v20 }
  0xf6   : > { %1063 = vmatprep.subr.msk.bf16.mxu0 %vm440_vm1, %v1060_v21  ;;  %1127 = vmatpush3.bf16.msra.mxu1 %v1294_v28 }
  0xf7   : > { %1152 = vmatprep.subr.bf16.mxu1 %v1575_v0 }
  0xf9   : > { %568 = vmatpush1.bf16.msra.mxu0 %v514_v24  ;;  %1129 = vmatmul.mubr.bf16.vlgmr.msra.gmra.mrb[0].mxu1 %v397_v31 }
  0xfa   : > { %1132 = vmatprep.subr.bf16.mxu0 %v1575_v0  ;;  %1153 = vmatpush3.bf16.msra.mxu1 %v1295_v32 }
  0xfb   : > { %1168 = vmatprep.mubr.msk.bf16.mxu1 %vm1577_vm0, %v1575_v0  ;;  %1154 = vmatprep.subr.bf16.mxu1 %v1575_v0 }
  0xfc   : > { %1064 = vmatmul.mubr.msk.bf16.vlgmr.msra.gmra.mrb[8].mxu0 %vm436_vm2, %v396_v33 }
  0xfd   : > { %1133 = vmatpush3.bf16.msra.mxu0 %v1295_v32  ;;  %1148 = vmatprep.mubr.msk.bf16.mxu0 %vm1577_vm0, %v1575_v0 }
  0xfe   : > { %1134 = vmatprep.subr.bf16.mxu0 %v1575_v0  ;;  %1155 = vmatpush3.bf16.msra.mxu1 %v1296_v34 }
  0xff   : > { %1156 = vmatprep.subr.bf16.mxu1 %v1575_v0 }
 0x101   : > { %1135 = vmatpush3.bf16.msra.mxu0 %v1296_v34 }
 0x102   : > { %1136 = vmatprep.subr.bf16.mxu0 %v1575_v0  ;;  %1157 = vmatpush3.bf16.msra.mxu1 %v1297_v35 }
 0x103   : > { %1158 = vmatprep.subr.bf16.mxu1 %v1575_v0 }
 0x105   : > { %1137 = vmatpush3.bf16.msra.mxu0 %v1297_v35 }
 0x106   : > { %1138 = vmatprep.subr.bf16.mxu0 %v1575_v0  ;;  %1159 = vmatpush3.bf16.msra.mxu1 %v1298_v36 }
 0x107   : > { %1160 = vmatprep.subr.bf16.mxu1 %v1575_v0 }
 0x109   : > { %1139 = vmatpush3.bf16.msra.mxu0 %v1298_v36 }
 0x10a   : > { %1140 = vmatprep.subr.bf16.mxu0 %v1575_v0  ;;  %1161 = vmatpush3.bf16.msra.mxu1 %v1299_v37 }
 0x10b   : > { %1162 = vmatprep.subr.bf16.mxu1 %v1575_v0 }
 0x10d   : > { %1141 = vmatpush3.bf16.msra.mxu0 %v1299_v37 }
 0x10e   : > { %1142 = vmatprep.subr.bf16.mxu0 %v1575_v0  ;;  %1163 = vmatpush3.bf16.msra.mxu1 %v1300_v38 }
 0x10f   : > { %1164 = vmatprep.subr.bf16.mxu1 %v1575_v0 }
 0x111   : > { %1143 = vmatpush3.bf16.msra.mxu0 %v1300_v38 }
 0x112   : > { %1144 = vmatprep.subr.bf16.mxu0 %v1575_v0  ;;  %1165 = vmatpush3.bf16.msra.mxu1 %v1301_v40 }
 0x113   : > { %1166 = vmatprep.subr.bf16.mxu1 %v1575_v0 }
 0x115   : > { %1145 = vmatpush3.bf16.msra.mxu0 %v1301_v40 }
 0x116   : > { %1146 = vmatprep.subr.bf16.mxu0 %v1575_v0  ;;  %1167 = vmatpush3.bf16.msra.mxu1 %v1302_v42 }
 0x119   : > { %1147 = vmatpush3.bf16.msra.mxu0 %v1302_v42  ;;  %1169 = vmatmul.mubr.bf16.vlgmr.msra.gmra.mrb[4].mxu1 %v400_v43 }
 0x11c   : > { %1149 = vmatmul.mubr.bf16.vlgmr.msra.gmra.mrb[12].mxu0 %v397_v31 }
 0x1b7   : > { %v481_v44 = vpop.f32.mrb[0].mxu0 }
 0x1b8   : > { %v483_v45 = vpop.f32.mrb[1].mxu0 }
 0x1b9   : > { %v485_v46 = vpop.f32.mrb[2].mxu0 }
 0x1ba   : > { %v486_v47 = vpop.f32.mrb[3].mxu0 }
 0x1c3   : > { %v553_v49 = vpop.f32.mrb[4].mxu0 }
 0x1c4   : > { %v554_v50 = vadd.f32 %v553_v49, %v481_v44  ;;  %v555_v51 = vpop.f32.mrb[5].mxu0 }
 0x1c5   : > { %v556_v52 = vadd.f32 %v555_v51, %v483_v45  ;;  %v557_v53 = vpop.f32.mrb[6].mxu0 }
 0x1c6   : > { %v558_v54 = vpop.f32.mrb[7].mxu0 }
 0x1cc   : > { %v720_v58 = vpop.f32.mrb[0].mxu1 }
 0x1cd   : > { %v1130_v60 = vpop.f32.mrb[1].mxu1 }
 0x1ce   : > { %v723_v63 = vpop.f32.mrb[2].mxu1 }
 0x1cf   : > { %v597_v62 = vpop.f32.mrb[8].mxu0  ;;  %v1131_v2 = vpop.f32.mrb[3].mxu1 }
 0x1d0   : > { %v604_v0 = vadd.f32 %v597_v62, %v554_v50  ;;  %v599_v1 = vpop.f32.mrb[9].mxu0 }
 0x1d1   : > { %v605_v3 = vadd.f32 %v599_v1, %v556_v52  ;;  %v601_v4 = vpop.f32.mrb[10].mxu0 }
 0x1d2   : > { %v859_v5 = vadd.f32 %v858_v59, %v604_v0  ;;  %v602_v6 = vpop.f32.mrb[11].mxu0 }
 0x1d3   : > { %v871_v8 = vmul.f32 1.442695, %v605_v3 }
 0x1d4   : > { %1303 = vtanh.f32 %v859_v5 }
 0x1d5   : > { %1305 = vpow2.f32 %v871_v8 }
 0x1d6   : > { %1307 = vlog2.f32 %v862_v7 }
 0x1de   : > { %v1304_v9 = vpop.eup %1303 }
 0x1df   : > { %v1306_v10 = vpop.eup %1305 }
 0x1e0   : > { %v873_v12 = vmul.f32 %v1306_v10, %v1304_v9  ;;  %v1308_v13 = vpop.eup %1307 }
 0x1e1   : > { %v864_v14 = vmul.f32 0.6931472, %v1308_v13 }
 0x1e3   : > { %v869_v16 = vmul.f32 %v868_v15, %v864_v14 }
 0x1e5   : > { %v870_v17 = vsub.f32 1.0, %v869_v16 }
 0x1e7   : > { %v874_v24 = vsub.f32 %v870_v17, %v873_v12 }
 0x1e9   : > { %v875_v32 = vmul.f32 %v874_v24, %v1911_v29 }
 0x1ec   : > { %v848_v19 = vpop.f32.mrb[4].mxu1 }
 0x1ed   : > { %v1170_v20 = vpop.f32.mrb[5].mxu1 }
 0x1ee   : > { %v851_v22 = vpop.f32.mrb[6].mxu1 }
 0x1ef   : > { %v808_v21 = vpop.f32.mrb[12].mxu0  ;;  %v1171_v27 = vpop.f32.mrb[7].mxu1 }
 0x1f0   : > { %v809_v23 = vadd.f32 %v808_v21, %v720_v58  ;;  %v1150_v26 = vpop.f32.mrb[13].mxu0 }
 0x1f1   : > { %v811_v28 = vpop.f32.mrb[14].mxu0 }
 0x1f2   : > { %v854_v30 = vadd.f32 %v848_v19, %v809_v23  ;;  %v1151_v31 = vpop.f32.mrb[15].mxu0 }
 0x1f4   : > { %v880_v33 = vadd.f32 %v879_v25, %v854_v30 }
 0x1f6   : > { %v881_v34 = vadd.f32 %v880_v33, %v875_v32 }
 0x1f8   : > { %882 = vst [vmem:[%s388_s28] sm:$0xff] %v881_v34 }
 0x1f9   : > { %1494 = shalt.err (!%p1491_p5)
}
 0x1fa   : > { %s1495_s20 = scalar_lea.hbm %s1950_s2, 128  ;;  %s1499_s8 = scalar_lea.hbm %s2000_s7, 512 }
 0x1fb   : > { %p1496_p11 = scmp.ne.s32.totalorder %s1950_s2, %s1495_s20  ;;  %p1500_p12 = scmp.lt.u32.totalorder %s1950_s2, %s2000_s7 }
 0x1fc   : > { %p1501_p3 = scmp.lt.u32.totalorder %s1499_s8, %s1495_s20  ;;  %p1503_p0 = scmp.lt.u32.totalorder %s1495_s20, %s1950_s2 }
 0x1fd   : > { %p1497_p1 = pnand %p1496_p11, %p2030_p2 }
 0x1fe   : > { %p1502_p13 = por %p1501_p3, %p1500_p12 }
 0x1ff   : > { %p1498_p8 = pneg %p1497_p1 }
 0x200   : > { %p1504_p9 = por %p1503_p0, %p1502_p13 }
 0x202   : > { %p1505_p10 = pnand %p1504_p9, %p1498_p8 }
 0x204   : > { %1508 = shalt.err (!%p1505_p10)
}
 0x205   : > { %1192 = dma.vmem_to_hbm [thread:$0]  (%p2030_p2), %s1952_s17, 128, %s1950_s2, %s884_s16  }
 0x206 PF: > { %p1227_p4 = scmp.ge.s32.totalorder %s1563_s27, 2  ;;  %s909_s23 = sand.u32 1, %s1551_s24  }
 0x207   : > { %p2031_p6 = scmp.ne.s32.totalorder %s2020_s15, 0  ;;  %s910_s4 = scalar_lea.sflag [#allocation4], %s909_s23 }
 0x209   : > { %p1215_p7 = pnand %p1227_p4, %p2031_p6 }
 0x20b   : > { %1546 = dma.done.wait (!%p1215_p7), %s910_s4, 128  }
 0x20c   : > { %1548 = vsyncadd (!%p1215_p7), %s910_s4, 4294967168  ;;  %p25_p5 = scmp.ge.s32.totalorder %s1758_s11, 6   ;;  %s2032_s24 = smov %s1555_s25 }
 0x20d   : > { %s2033_s25 = smov %s1559_s26  ;;  %s2034_s26 = smov %s1769_s12 }
 0x20e   : > { %s2035_s27 = smov %s1758_s11  ;;  %27 = sbr.rel (!%p25_p5) target bundleno = 14 (0xe), region = 122 }
 0x215   :  { %915 = vsyncpa [#allocation3], 1 }
 0x216   :  { %917 = vsyncpa [#allocation3 + $0x1], 1 }
 0x217   :  { %918 = vsyncpa [#allocation6], 1 }
 0x218   :  { %920 = vsyncpa [#allocation6 + $0x1], 1 }
 0x219   :  { %921 = vsyncpa [#allocation9], 1 }
 0x21a   :  { %922 = vsyncpa [#allocation12], 1 }
 0x21b   :  { %923 = vsyncpa [#allocation4], 1 }
 0x21c   :  { %925 = vsyncpa [#allocation4 + $0x1], 1 }

</bundles_post_ra>
